<compile_context>
chip_gen: v5e
topology: v5e:2x2
jax: 0.10.0
libtpu: 0.0.40
codegen_flags: <defaults>
</compile_context>

<pallas_src>
import math
import functools

import jax
import jax.numpy as jnp
from jax.experimental import pallas as pl
from jax.experimental.pallas import tpu as pltpu


def _poly_nonlin(y, masks):
    """z = y ** expo via exponentiation-by-squaring.

    `masks` is a list of (pm_j, nm_j) pairs, one per bit j of (expo - 1), each
    broadcastable against y with values in {0, 1} and nm_j == 1 - pm_j.  The
    per-bit factor is  pm_j * y**(2**j) + nm_j  -- an arithmetic select that
    needs no boolean broadcast.  Repeated multiplies keep exact integer-power
    semantics for negative bases (matches torch.pow with integer exponents).
    """
    z = y
    cur = y
    for j, (pm_j, nm_j) in enumerate(masks):
        if j > 0:
            cur = cur * cur                       # y ** (2**j)
        z = z * (pm_j * cur + nm_j)
    return z


def _vq_kernel_relu(xt_ref, p1t_ref, p2t_ref, bt_ref, out_ref):
    """out^T = b^T + P2^T @ relu(P1^T @ x^T)   (signs folded into P2^T)."""
    y = jnp.dot(p1t_ref[...], xt_ref[...], preferred_element_type=jnp.float32)
    z = jnp.maximum(y, 0.0)
    out_ref[...] = bt_ref[...] + jnp.dot(p2t_ref[...], z,
                                         preferred_element_type=jnp.float32)


def _vq_kernel_pow(xt_ref, p1t_ref, p2t_ref, bt_ref, pm_ref, nm_ref, out_ref,
                   *, nbits):
    """out^T = b^T + P2^T @ (P1^T @ x^T)**expo  (1/n! and signs in P2^T)."""
    y = jnp.dot(p1t_ref[...], xt_ref[...], preferred_element_type=jnp.float32)
    z = _poly_nonlin(y, [(pm_ref[j], nm_ref[j]) for j in range(nbits)])
    out_ref[...] = bt_ref[...] + jnp.dot(p2t_ref[...], z,
                                         preferred_element_type=jnp.float32)


def _build_fused_weights(params_pos, params_neg, *, use_relu):
    """Pack (nx, D, H) pos/neg params into P1^T:(W, D) and P2^T:(D, W), W=2*nx*H.

    P2^T carries the -1 of the negative branch and (power path only) the 1/n!
    factors, so the kernel body is just two matmuls + the nonlinearity.
    """
    nx, D, H = params_pos.shape
    p1t = jnp.concatenate(
        [jnp.transpose(params_pos, (0, 2, 1)).reshape(nx * H, D),
         jnp.transpose(params_neg, (0, 2, 1)).reshape(nx * H, D)], axis=0)

    if use_relu:
        coeff = jnp.ones((nx, 1, 1), jnp.float32)
    else:
        # k[n] = n!  (matches PyTorch: self.k = [1] + [1!, ..., (nx-1)!])
        coeff = jnp.asarray([1.0 / math.factorial(n) for n in range(nx)],
                            jnp.float32).reshape(nx, 1, 1)

    p2t = jnp.concatenate(
        [jnp.transpose(params_pos * coeff, (1, 0, 2)).reshape(D, nx * H),
         jnp.transpose(-params_neg * coeff, (1, 0, 2)).reshape(D, nx * H)],
        axis=1)
    return p1t, p2t


def _build_power_masks(nx, H):
    """Per fused row: {0,1} float masks for each bit of (exponent - 1)."""
    W = 2 * nx * H
    nbits = max(1, (nx - 1).bit_length())
    em1 = (jnp.arange(W, dtype=jnp.int32) // H) % nx            # exponent - 1
    pm = jnp.stack([((em1 >> j) & 1).astype(jnp.float32)
                    for j in range(nbits)]).reshape(nbits, W, 1)
    return pm, 1.0 - pm, nbits


def _round_up(v, m):
    return (v + m - 1) // m * m


def _choose_block_b(B):
    # Small / medium batch: one full-extent block (lane dim == full array dim,
    # so the (8,128) layout rule holds without padding).
    if B <= 512:
        return B
    # Large batch: 128-aligned tiles capped at 1024 rows so the (W, block_b)
    # f32 intermediates stay ~1 MiB (well under scoped-VMEM defaults on
    # v5e/v6e/v7x) and the grid has >= 2 steps (v7x megacore can shard it).
    return min(1024, _round_up(pl.cdiv(B, 2), 128))


def vq_forward(x, params_pos, params_neg, b, *, use_relu, block_b=None,
               force_pallas=False):
    """Fused VqTrained forward.  x: (B, D) -> (B, D)."""
    nx, D, H = params_pos.shape
    B = x.shape[0]
    W = 2 * nx * H

    p1t, p2t = _build_fused_weights(params_pos, params_neg, use_relu=use_relu)
    pm, nm, nbits = _build_power_masks(nx, H)

    if B < 128 and not force_pallas:
        # Launch-overhead-bound regime (the PyTorch-faithful workload is B==1):
        # the whole computation is a handful of vregs, so the fused jnp
        # expression beats any pallas_call.  Same packed math as the kernel.
        y = jnp.dot(x, p1t.T)
        if use_relu:
            z = jnp.maximum(y, 0.0)
        else:
            z = _poly_nonlin(y, [(pm[j].reshape(1, W), nm[j].reshape(1, W))
                                 for j in range(nbits)])
        return b + jnp.dot(z, p2t.T)

    if block_b is None:
        block_b = _choose_block_b(B)
    b_pad = _round_up(B, block_b)

    xt = jnp.transpose(x)                              # (D, B): batch on lanes
    if b_pad != B:
        xt = jnp.pad(xt, ((0, 0), (0, b_pad - B)))     # zero cols: safe in power path
    bt = jnp.transpose(b)                              # (D, 1)

    def _whole(shape):
        n = len(shape)
        return pl.BlockSpec(shape, lambda i, _n=n: (0,) * _n)

    batch_spec = pl.BlockSpec((D, block_b), lambda i: (0, i))

    in_specs = [batch_spec,                            # x^T, blocked over batch
                _whole((W, D)),                        # P1^T, resident (~4 KiB)
                _whole((D, W)),                        # P2^T, resident
                _whole((D, 1))]                        # bias^T
    inputs = [xt, p1t, p2t, bt]

    if use_relu:
        kernel = _vq_kernel_relu
    else:
        kernel = functools.partial(_vq_kernel_pow, nbits=nbits)
        in_specs += [_whole((nbits, W, 1)), _whole((nbits, W, 1))]
        inputs += [pm, nm]

    out_t = pl.pallas_call(
        kernel,
        out_shape=jax.ShapeDtypeStruct((D, b_pad), jnp.float32),
        grid=(b_pad // block_b,),
        in_specs=in_specs,
        out_specs=batch_spec,
        compiler_params=pltpu.CompilerParams(
            dimension_semantics=("parallel",)),
        cost_estimate=pl.CostEstimate(
            flops=4 * b_pad * D * W,
            transcendentals=0,
            bytes_accessed=4 * (2 * b_pad * D + 2 * D * W + 2 * W + D)),
    )(*inputs)

    return jnp.transpose(out_t[:, :B])


def vq_reference(x, params_pos, params_neg, b, *, use_relu):
    """Pure-jnp mirror of the PyTorch forward (integer powers kept exact)."""
    nx = params_pos.shape[0]
    y1 = jnp.einsum('bd,ndh->nbh', x, params_pos)      # (nx, B, H)
    y2 = jnp.einsum('bd,ndh->nbh', x, params_neg)
    if use_relu:
        z1 = jnp.maximum(y1, 0.0)
        z2 = -jnp.maximum(y2, 0.0)
    else:
        kf = [float(math.factorial(n)) for n in range(nx)]
        z1 = jnp.stack([y1[n] ** (n + 1) / kf[n] for n in range(nx)])
        z2 = -jnp.stack([y2[n] ** (n + 1) / kf[n] for n in range(nx)])
    return (b
            + jnp.einsum('nbh,ndh->bd', z1, params_pos)
            + jnp.einsum('nbh,ndh->bd', z2, params_neg))


if __name__ == "__main__":
    # args: nx=4, n_particles=2, dimension=2, hidden_dim=32  ->  D = 4, W = 256
    nx, n_particles, dimension, hidden_dim = 4, 2, 2, 32
    D = n_particles * dimension

    # Faithful to the PyTorch init expression (note its precedence:
    # ((2/n_particles)*dimension)/hidden_dim/nx).
    scale = math.sqrt(2.0 / n_particles * dimension / hidden_dim / nx)
    key = jax.random.PRNGKey(0)
    k_pos, k_neg, k_x = jax.random.split(key, 3)

    params_pos = jax.random.normal(k_pos, (nx, D, hidden_dim), jnp.float32) * scale
    params_neg = jax.random.normal(k_neg, (nx, D, hidden_dim), jnp.float32) * scale
    b = jnp.zeros((1, D), jnp.float32)

    ok = True
    # (B, use_relu): B=1 is PyTorch-faithful; B=8 is a small batched extension;
    # B=1000 exercises the 128-aligned tiling (block_b=512, grid=2, pad->1024).
    cases = [(1, True), (1, False), (8, False), (1000, True), (1000, False)]
    for B, use_relu in cases:
        x = jax.random.normal(jax.random.fold_in(k_x, B), (B, D), jnp.float32)
        out = jax.block_until_ready(
            vq_forward(x, params_pos, params_neg, b,
                       use_relu=use_relu, force_pallas=True))
        ref = vq_reference(x, params_pos, params_neg, b, use_relu=use_relu)
        ok = ok and bool(jnp.allclose(out, ref, atol=1e-5, rtol=1e-5))

    # Auto-dispatch fallback (fused jnp, no pallas_call) for the tiny-B regime.
    x1 = jax.random.normal(jax.random.fold_in(k_x, 0), (1, D), jnp.float32)
    small = vq_forward(x1, params_pos, params_neg, b, use_relu=False)
    ok = ok and bool(jnp.allclose(
        small, vq_reference(x1, params_pos, params_neg, b, use_relu=False),
        atol=1e-5, rtol=1e-5))

    print("KERNEL_OK" if ok else "MISMATCH")
</pallas_src>

<mosaic_0001>
module attributes {stable_mosaic.version = 11 : i64} {
  func.func @_vq_kernel_relu(%arg0: i32, %arg1: memref<4x1xf32, #tpu.memory_space<vmem>>, %arg2: memref<256x4xf32, #tpu.memory_space<vmem>>, %arg3: memref<4x256xf32, #tpu.memory_space<vmem>>, %arg4: memref<4x1xf32, #tpu.memory_space<vmem>>, %arg5: memref<4x1xf32, #tpu.memory_space<vmem>>) attributes {dimension_semantics = [#tpu.dimension_semantics<parallel>], iteration_bounds = array<i64: 1>, scalar_prefetch = 0 : i64, scratch_operands = 0 : i64, tpu.core_type = #tpu.core_type<tc>, window_params = [{transform_indices = @transform_0, window_bounds = array<i64: 4, 1>}, {pipeline_mode = #tpu.pipeline_mode<synchronous>, transform_indices = @transform_1, window_bounds = array<i64: 256, 4>}, {pipeline_mode = #tpu.pipeline_mode<synchronous>, transform_indices = @transform_2, window_bounds = array<i64: 4, 256>}, {pipeline_mode = #tpu.pipeline_mode<synchronous>, transform_indices = @transform_3, window_bounds = array<i64: 4, 1>}, {transform_indices = @transform_4, window_bounds = array<i64: 4, 1>}]} {
    %c0 = arith.constant 0 : index
    %c0_0 = arith.constant 0 : index
    %0 = vector.load %arg2[%c0, %c0_0] : memref<256x4xf32, #tpu.memory_space<vmem>>, vector<256x4xf32>
    %c0_1 = arith.constant 0 : index
    %c0_2 = arith.constant 0 : index
    %1 = vector.load %arg1[%c0_1, %c0_2] : memref<4x1xf32, #tpu.memory_space<vmem>>, vector<4x1xf32>
    %cst = arith.constant dense<0.000000e+00> : vector<256x1xf32>
    %2 = tpu.matmul %0, %1, %cst {dimension_numbers = #tpu.dot_dimension_numbers<[1], [0], [0], [1], [0, 0, 1, 1], [], []>} : vector<256x4xf32>, vector<4x1xf32>, vector<256x1xf32> -> vector<256x1xf32>
    %cst_3 = arith.constant 0.000000e+00 : f32
    %3 = vector.broadcast %cst_3 : f32 to vector<256x1xf32>
    %4 = arith.maximumf %2, %3 : vector<256x1xf32>
    %c0_4 = arith.constant 0 : index
    %c0_5 = arith.constant 0 : index
    %5 = vector.load %arg4[%c0_4, %c0_5] : memref<4x1xf32, #tpu.memory_space<vmem>>, vector<4x1xf32>
    %c0_6 = arith.constant 0 : index
    %c0_7 = arith.constant 0 : index
    %6 = vector.load %arg3[%c0_6, %c0_7] : memref<4x256xf32, #tpu.memory_space<vmem>>, vector<4x256xf32>
    %cst_8 = arith.constant dense<0.000000e+00> : vector<4x1xf32>
    %7 = tpu.matmul %6, %4, %cst_8 {dimension_numbers = #tpu.dot_dimension_numbers<[1], [0], [0], [1], [0, 0, 1, 1], [], []>} : vector<4x256xf32>, vector<256x1xf32>, vector<4x1xf32> -> vector<4x1xf32>
    %8 = arith.addf %5, %7 : vector<4x1xf32>
    %c0_9 = arith.constant 0 : index
    %c0_10 = arith.constant 0 : index
    %9 = vector.load %arg5[%c0_9, %c0_10] : memref<4x1xf32, #tpu.memory_space<vmem>>, vector<4x1xf32>
    tpu.vector_store %arg5[%c0_9, %c0_10], %8 {strides = array<i32>} : memref<4x1xf32, #tpu.memory_space<vmem>>, vector<4x1xf32>,
    return
  }
  func.func @transform_0(%arg0: i32) -> (i32, i32) {
    %c0_i32 = arith.constant 0 : i32
    %c0_i32_0 = arith.constant 0 : i32
    return %c0_i32, %arg0 : i32, i32
  }
  func.func @transform_1(%arg0: i32) -> (i32, i32) {
    %c0_i32 = arith.constant 0 : i32
    %c0_i32_0 = arith.constant 0 : i32
    %c0_i32_1 = arith.constant 0 : i32
    return %c0_i32, %c0_i32_0 : i32, i32
  }
  func.func @transform_2(%arg0: i32) -> (i32, i32) {
    %c0_i32 = arith.constant 0 : i32
    %c0_i32_0 = arith.constant 0 : i32
    %c0_i32_1 = arith.constant 0 : i32
    return %c0_i32, %c0_i32_0 : i32, i32
  }
  func.func @transform_3(%arg0: i32) -> (i32, i32) {
    %c0_i32 = arith.constant 0 : i32
    %c0_i32_0 = arith.constant 0 : i32
    %c0_i32_1 = arith.constant 0 : i32
    return %c0_i32, %c0_i32_0 : i32, i32
  }
  func.func @transform_4(%arg0: i32) -> (i32, i32) {
    %c0_i32 = arith.constant 0 : i32
    %c0_i32_0 = arith.constant 0 : i32
    return %c0_i32, %arg0 : i32, i32
  }
}

</mosaic_0001>

<bundles_post_ra>
// kernel: tpu_custom_call.1
= control target key start
LH: loop header
LB: loop body
LE: loop exit
PB: predicated region body
PF: predicated region fallthrough
CT: control target
= control target key end

     0   :  { %vm147_vm0 = vcmask 1043456   ;;  %vm50_vm1 = vcmask 31744   ;;  %vm345_vm2 = vcmask 3072   ;;  %s582_s0 = inlined_call_operand.vmem [shape: f32[4,1], index: 0, kind: input, shape index: {}]   ;;  %s583_s1 = inlined_call_operand.vmem [shape: f32[256,4], index: 1, kind: input, shape index: {}]   ;;  %s584_s2 = inlined_call_operand.vmem [shape: f32[4,256], index: 2, kind: input, shape index: {}]   ;;  %s585_s3 = inlined_call_operand.vmem [shape: f32[4,1], index: 3, kind: input, shape index: {}]   ;;  %s586_s4 = inlined_call_operand.vmem [shape: f32[4,1], index: 4, kind: output, shape index: {}]  }
   0x1   :  { %v49_v0 = vld [vmem:[%s582_s0] sm:$0xf]  ;;  %v39_v2 = vld [vmem:[%s583_s1 + $0xb0] sm:$0xff]  ;;  %v28_v3 = vld [vmem:[%s583_s1 + $0x58] sm:$0xff] }
   0x2   :  { %v17_v1 = vld [vmem:[%s583_s1] sm:$0xff]  ;;  %351 = vmatpush.msk.msra.mxu0 %vm147_vm0, %v49_v0  ;;  %386 = vmatpush.msk.msra.mxu3 %vm147_vm0, %v49_v0  ;;  %v18_v4 = vld [vmem:[%s583_s1 + $0x8] sm:$0xff]  ;;  %v40_v5 = vld [vmem:[%s583_s1 + $0xb8] sm:$0xff] }
   0x3   :  { %352 = vmatmul.msk.f32.vlgmr.msra.gmra.mxu0 %vm50_vm1, %v17_v1  ;;  %374 = vmatmul.msk.f32.vlgmr.msra.gmra.mxu3 %vm50_vm1, %v39_v2  ;;  %v32_v6 = vld [vmem:[%s583_s1 + $0x78] sm:$0xff]  ;;  %v29_v7 = vld [vmem:[%s583_s1 + $0x60] sm:$0xff]  ;;  %v19_v8 = vld [vmem:[%s583_s1 + $0x10] sm:$0xff] }
   0x4   :  { %385 = vmatpush.msk.msra.mxu2 %vm147_vm0, %v49_v0  ;;  %384 = vmatpush.msk.msra.mxu1 %vm147_vm0, %v49_v0  ;;  %v41_v9 = vld [vmem:[%s583_s1 + $0xc0] sm:$0xff]  ;;  %v30_v11 = vld [vmem:[%s583_s1 + $0x68] sm:$0xff]  ;;  %v20_v12 = vld [vmem:[%s583_s1 + $0x18] sm:$0xff] }
   0x5   :  { %363 = vmatmul.msk.f32.vlgmr.msra.gmra.mxu1 %vm50_vm1, %v28_v3  ;;  %367 = vmatmul.msk.f32.vlgmr.msra.gmra.mxu2 %vm50_vm1, %v32_v6  ;;  %v33_v10 = vld [vmem:[%s583_s1 + $0x80] sm:$0xff]  ;;  %v42_v13 = vld [vmem:[%s583_s1 + $0xc8] sm:$0xff]  ;;  %v31_v15 = vld [vmem:[%s583_s1 + $0x70] sm:$0xff] }
   0x6   :  { %v34_v14 = vld [vmem:[%s583_s1 + $0x88] sm:$0xff]  ;;  %v21_v16 = vld [vmem:[%s583_s1 + $0x20] sm:$0xff]  ;;  %v43_v17 = vld [vmem:[%s583_s1 + $0xd0] sm:$0xff] }
   0x7   :  { %v35_v18 = vld [vmem:[%s583_s1 + $0x90] sm:$0xff]  ;;  %v22_v19 = vld [vmem:[%s583_s1 + $0x28] sm:$0xff]  ;;  %v44_v20 = vld [vmem:[%s583_s1 + $0xd8] sm:$0xff] }
   0x8   :  { %v36_v21 = vld [vmem:[%s583_s1 + $0x98] sm:$0xff]  ;;  %v23_v22 = vld [vmem:[%s583_s1 + $0x30] sm:$0xff]  ;;  %v45_v23 = vld [vmem:[%s583_s1 + $0xe0] sm:$0xff] }
   0x9   :  { %v37_v24 = vld [vmem:[%s583_s1 + $0xa0] sm:$0xff]  ;;  %v24_v25 = vld [vmem:[%s583_s1 + $0x38] sm:$0xff]  ;;  %v46_v26 = vld [vmem:[%s583_s1 + $0xe8] sm:$0xff] }
   0xa   :  { %v38_v27 = vld [vmem:[%s583_s1 + $0xa8] sm:$0xff]  ;;  %v25_v28 = vld [vmem:[%s583_s1 + $0x40] sm:$0xff]  ;;  %v47_v29 = vld [vmem:[%s583_s1 + $0xf0] sm:$0xff] }
   0xb   :  { %353 = vmatmul.msk.f32.gmra.mxu0 %vm50_vm1, %v18_v4  ;;  %375 = vmatmul.msk.f32.gmra.mxu3 %vm50_vm1, %v40_v5  ;;  %v26_v30 = vld [vmem:[%s583_s1 + $0x48] sm:$0xff]  ;;  %v48_v31 = vld [vmem:[%s583_s1 + $0xf8] sm:$0xff]  ;;  %v27_v32 = vld [vmem:[%s583_s1 + $0x50] sm:$0xff] }
   0xc   :  { %v297_v0 = vld [vmem:[%s584_s2] sm:$0xff] }
   0xd   :  { %364 = vmatmul.msk.f32.gmra.mxu1 %vm50_vm1, %v29_v7  ;;  %368 = vmatmul.msk.f32.gmra.mxu2 %vm50_vm1, %v33_v10  ;;  %299 = vst [vmem:[#allocation1] ss:$2 sm:$0xff] %v297_v0 }
  0x13   :  { %354 = vmatmul.msk.f32.gmra.mxu0 %vm50_vm1, %v19_v8  ;;  %376 = vmatmul.msk.f32.gmra.mxu3 %vm50_vm1, %v41_v9 }
  0x15   :  { %365 = vmatmul.msk.f32.gmra.mxu1 %vm50_vm1, %v30_v11  ;;  %369 = vmatmul.msk.f32.gmra.mxu2 %vm50_vm1, %v34_v14 }
  0x1b   :  { %355 = vmatmul.msk.f32.gmra.mxu0 %vm50_vm1, %v20_v12  ;;  %377 = vmatmul.msk.f32.gmra.mxu3 %vm50_vm1, %v42_v13 }
  0x1d   :  { %366 = vmatmul.msk.f32.gmra.mxu1 %vm50_vm1, %v31_v15  ;;  %370 = vmatmul.msk.f32.gmra.mxu2 %vm50_vm1, %v35_v18 }
  0x23   :  { %356 = vmatmul.msk.f32.gmra.mxu0 %vm50_vm1, %v21_v16  ;;  %378 = vmatmul.msk.f32.gmra.mxu3 %vm50_vm1, %v43_v17 }
  0x25   :  { %371 = vmatmul.msk.f32.gmra.mxu2 %vm50_vm1, %v36_v21 }
  0x2b   :  { %357 = vmatmul.msk.f32.gmra.mxu0 %vm50_vm1, %v22_v19  ;;  %379 = vmatmul.msk.f32.gmra.mxu3 %vm50_vm1, %v44_v20 }
  0x2d   :  { %372 = vmatmul.msk.f32.gmra.mxu2 %vm50_vm1, %v37_v24 }
  0x33   :  { %358 = vmatmul.msk.f32.gmra.mxu0 %vm50_vm1, %v23_v22  ;;  %380 = vmatmul.msk.f32.gmra.mxu3 %vm50_vm1, %v45_v23 }
  0x35   :  { %373 = vmatmul.msk.f32.gmra.mxu2 %vm50_vm1, %v38_v27 }
  0x3b   :  { %359 = vmatmul.msk.f32.gmra.mxu0 %vm50_vm1, %v24_v25  ;;  %381 = vmatmul.msk.f32.gmra.mxu3 %vm50_vm1, %v46_v26 }
  0x43   :  { %360 = vmatmul.msk.f32.gmra.mxu0 %vm50_vm1, %v25_v28  ;;  %382 = vmatmul.msk.f32.gmra.mxu3 %vm50_vm1, %v47_v29 }
  0x4b   :  { %361 = vmatmul.msk.f32.gmra.mxu0 %vm50_vm1, %v26_v30  ;;  %383 = vmatmul.msk.f32.gmra.mxu3 %vm50_vm1, %v48_v31  ;;  %v300_v30 = vld.sshfl [vmem:[#allocation1] sm:$0xff pattern:$0x75316420] }
  0x53   :  { %362 = vmatmul.msk.f32.gmra.mxu0 %vm50_vm1, %v27_v32 }
  0x80   :  { %v543_v33 = vpop.f32.mrf.mxu0 }
  0x81   :  { %v264_v28 = vmax.f32 %v543_v33, 0.0 }
  0x82   :  { %v201_v34 = vpop.f32.mrf.mxu1 }
  0x83   :  { %v275_v51 = vmax.f32 %v201_v34, 0.0 }
  0x86   :  { %v545_v35 = vpop.f32.mrf.mxu3 }
  0x87   :  { %v286_v24 = vmax.f32 %v545_v35, 0.0 }
  0x88   :  { %v547_v36 = vpop.f32.mrf.mxu0  ;;  %v213_v40 = vpop.f32.mrf.mxu2 }
  0x89   :  { %v279_v41 = vmax.f32 %v213_v40, 0.0  ;;  %v265_v27 = vmax.f32 %v547_v36, 0.0  ;;  %v301_v36 = vld.sshfl [vmem:[#allocation1 + $0x8] sm:$0xff pattern:$0x75316420] }
  0x8a   :  { %v204_v37 = vpop.f32.mrf.mxu1 }
  0x8b   :  { %304 = vmatpush.msrb.mxu1 %v279_v41  ;;  %v276_v49 = vmax.f32 %v204_v37, 0.0  ;;  %v296_v37 = vld [vmem:[%s585_s3] sm:$0xf] }
  0x8e   :  { %v549_v38 = vpop.f32.mrf.mxu3 }
  0x8f   :  { %v287_v22 = vmax.f32 %v549_v38, 0.0 }
  0x90   :  { %v551_v39 = vpop.f32.mrf.mxu0  ;;  %v557_v54 = vpop.f32.mrf.mxu2 }
  0x91   :  { %v266_v25 = vmax.f32 %v551_v39, 0.0  ;;  %v280_v35 = vmax.f32 %v557_v54, 0.0 }
  0x92   :  { %v207_v42 = vpop.f32.mrf.mxu1 }
  0x93   :  { %v277_v46 = vmax.f32 %v207_v42, 0.0 }
  0x96   :  { %v553_v43 = vpop.f32.mrf.mxu3 }
  0x97   :  { %v288_v19 = vmax.f32 %v553_v43, 0.0 }
  0x98   :  { %v555_v44 = vpop.f32.mrf.mxu0  ;;  %v559_v58 = vpop.f32.mrf.mxu2 }
  0x99   :  { %v267_v23 = vmax.f32 %v555_v44, 0.0  ;;  %v281_v34 = vmax.f32 %v559_v58, 0.0 }
  0x9a   :  { %v210_v45 = vpop.f32.mrf.mxu1 }
  0x9b   :  { %v278_v47 = vmax.f32 %v210_v45, 0.0 }
  0x9d   :  { %305 = vmatpush.msrb.mxu1 %v278_v47 }
  0x9e   :  { %v243_v48 = vpop.f32.mrf.mxu3 }
  0x9f   :  { %306 = vmatpush.msrb.mxu1 %v277_v46  ;;  %v289_v17 = vmax.f32 %v243_v48, 0.0 }
  0xa0   :  { %v180_v50 = vpop.f32.mrf.mxu0  ;;  %v561_v62 = vpop.f32.mrf.mxu2 }
  0xa1   :  { %307 = vmatpush.msrb.mxu1 %v276_v49  ;;  %v268_v20 = vmax.f32 %v180_v50, 0.0  ;;  %v282_v32 = vmax.f32 %v561_v62, 0.0 }
  0xa3   :  { %308 = vmatpush.msrb.mxu1 %v275_v51 }
  0xa6   :  { %v246_v52 = vpop.f32.mrf.mxu3 }
  0xa7   :  { %v290_v15 = vmax.f32 %v246_v52, 0.0 }
  0xa8   :  { %v183_v53 = vpop.f32.mrf.mxu0  ;;  %v225_v2 = vpop.f32.mrf.mxu2 }
  0xa9   :  { %v269_v18 = vmax.f32 %v183_v53, 0.0  ;;  %v283_v31 = vmax.f32 %v225_v2, 0.0 }
  0xae   :  { %v249_v55 = vpop.f32.mrf.mxu3 }
  0xaf   :  { %v291_v13 = vmax.f32 %v249_v55, 0.0 }
  0xb0   :  { %v186_v56 = vpop.f32.mrf.mxu0  ;;  %v228_v10 = vpop.f32.mrf.mxu2 }
  0xb1   :  { %v270_v16 = vmax.f32 %v186_v56, 0.0  ;;  %v284_v29 = vmax.f32 %v228_v10, 0.0 }
  0xb6   :  { %v252_v57 = vpop.f32.mrf.mxu3 }
  0xb7   :  { %v292_v11 = vmax.f32 %v252_v57, 0.0 }
  0xb8   :  { %v189_v59 = vpop.f32.mrf.mxu0  ;;  %v231_v21 = vpop.f32.mrf.mxu2 }
  0xb9   :  { %v271_v14 = vmax.f32 %v189_v59, 0.0  ;;  %v285_v26 = vmax.f32 %v231_v21, 0.0 }
  0xbe   :  { %v255_v60 = vpop.f32.mrf.mxu3 }
  0xbf   :  { %v293_v9 = vmax.f32 %v255_v60, 0.0 }
  0xc0   :  { %v192_v61 = vpop.f32.mrf.mxu0 }
  0xc1   :  { %v272_v12 = vmax.f32 %v192_v61, 0.0 }
  0xc6   :  { %v258_v63 = vpop.f32.mrf.mxu3 }
  0xc7   :  { %v294_v6 = vmax.f32 %v258_v63, 0.0 }
  0xc8   :  { %v195_v1 = vpop.f32.mrf.mxu0 }
  0xc9   :  { %v273_v7 = vmax.f32 %v195_v1, 0.0 }
  0xce   :  { %v261_v3 = vpop.f32.mrf.mxu3 }
  0xcf   :  { %v295_v4 = vmax.f32 %v261_v3, 0.0 }
  0xd0   :  { %v198_v5 = vpop.f32.mrf.mxu0 }
  0xd1   :  { %v274_v8 = vmax.f32 %v198_v5, 0.0  ;;  %324 = vmatpush.msrb.mxu2 %v295_v4 }
  0xd3   :  { %309 = vmatpush.msrb.mxu1 %v274_v8  ;;  %325 = vmatpush.msrb.mxu2 %v294_v6 }
  0xd5   :  { %310 = vmatpush.msrb.mxu1 %v273_v7  ;;  %326 = vmatpush.msrb.mxu2 %v293_v9 }
  0xd7   :  { %311 = vmatpush.msrb.mxu1 %v272_v12  ;;  %327 = vmatpush.msrb.mxu2 %v292_v11 }
  0xd9   :  { %312 = vmatpush.msrb.mxu1 %v271_v14  ;;  %328 = vmatpush.msrb.mxu2 %v291_v13 }
  0xdb   :  { %313 = vmatpush.msrb.mxu1 %v270_v16  ;;  %329 = vmatpush.msrb.mxu2 %v290_v15 }
  0xdd   :  { %314 = vmatpush.msrb.mxu1 %v269_v18  ;;  %330 = vmatpush.msrb.mxu2 %v289_v17 }
  0xdf   :  { %315 = vmatpush.msrb.mxu1 %v268_v20  ;;  %331 = vmatpush.msrb.mxu2 %v288_v19 }
  0xe1   :  { %316 = vmatpush.msrb.mxu1 %v267_v23  ;;  %332 = vmatpush.msrb.mxu2 %v287_v22 }
  0xe3   :  { %317 = vmatpush.msrb.mxu1 %v266_v25  ;;  %333 = vmatpush.msrb.mxu2 %v286_v24 }
  0xe5   :  { %318 = vmatpush.msrb.mxu1 %v265_v27  ;;  %334 = vmatpush.msrb.mxu2 %v285_v26 }
  0xe7   :  { %319 = vmatpush.msrb.mxu1 %v264_v28  ;;  %335 = vmatpush.msrb.mxu2 %v284_v29 }
  0xe8   :  { %320 = vmatmul.f32.vlgmr.msrb.gmra.mxu1 %v300_v30 }
  0xe9   :  { %336 = vmatpush.msrb.mxu2 %v283_v31 }
  0xeb   :  { %337 = vmatpush.msrb.mxu2 %v282_v32 }
  0xed   :  { %338 = vmatpush.msrb.mxu2 %v281_v34 }
  0xef   :  { %339 = vmatpush.msrb.mxu2 %v280_v35 }
  0xf0   :  { %340 = vmatmul.f32.vlgmr.msrb.gmra.mxu2 %v301_v36 }
 0x165   :  { %v321_v33 = vpop.f32.mrf.mxu1 }
 0x173   :  { %v341_v38 = vpop.f32.mrf.mxu2 }
 0x174   :  { %v342_v39 = vadd.f32 %v341_v38, %v321_v33 }
 0x176   :  { %v344_v40 = vadd.f32 %v342_v39, %v296_v37 }
 0x178   :  { %346 = vst.msk [vmem:[%s586_s4] sm:$0xf] %vm345_vm2, %v344_v40 }

</bundles_post_ra>
